<compile_context>
chip_gen: v7x
topology: tpu7x:2x2x1
jax: 0.10.0
libtpu: 0.0.40
codegen_flags: <defaults>
</compile_context>

<pallas_src>
import functools
import math

import jax
import jax.numpy as jnp
from jax import lax
from jax.experimental import pallas as pl
from jax.experimental.pallas import tpu as pltpu

EMBED_DIM = 300          # embedding_dim from the PyTorch module
NUM_EMBEDDINGS = 64      # synthetic vocabulary size (pickle not available)

# TODO(synk): the PyTorch module loads pre-trained weights from a pickle file;
# file I/O is out of scope here, so a deterministic random table stands in.


def _round_up(x, m):
    return (x + m - 1) // m * m


def _embedding_onehot_kernel(idx_ref, table_ref, out_ref):
    # idx_ref   : VMEM (TILE_S, 1)   int32  -- token ids for this row tile
    # table_ref : VMEM (Vp, Dp)      f32    -- lane-padded frozen table
    # out_ref   : VMEM (TILE_S, Dp)  f32    -- gathered (padded) embeddings
    tile_s = out_ref.shape[0]
    vp = table_ref.shape[0]
    ids = idx_ref[...]                                          # (TILE_S, 1)
    col = lax.broadcasted_iota(jnp.int32, (tile_s, vp), 1)      # vocab ids
    onehot = (col == ids).astype(jnp.bfloat16)                  # exact 0/1
    out_ref[...] = lax.dot_general(
        onehot, table_ref[...],
        dimension_numbers=(((1,), (0,)), ((), ())),
        preferred_element_type=jnp.float32,
    ).astype(out_ref.dtype)


@functools.partial(jax.jit, static_argnames=("d", "tile_s", "use_kernel"))
def _embedding_seq_fwd(indices, table_p, *, d, tile_s, use_kernel):
    """indices: int array (any leading shape); table_p: (Vp, Dp) f32 padded."""
    lead = indices.shape
    n = math.prod(lead) if lead else 1
    vp, dp = table_p.shape
    idx_flat = indices.reshape(n).astype(jnp.int32)

    if use_kernel is None:
        use_kernel = n >= 512        # below this, launch + plumbing dominates

    if not use_kernel:
        # Plain XLA gather path for tiny inputs (review item: skip the kernel).
        return table_p[idx_flat, :d].reshape(*lead, d)

    # Row tiling: multiples of 8 sublanes; default 512 rows fills the MXU M dim.
    ts = min(tile_s, _round_up(n, 8))
    np_rows = _round_up(n, ts)
    idx = jnp.pad(idx_flat, (0, np_rows - n)).reshape(np_rows, 1)

    # Explicit VMEM budget derived from the real tile footprint (review item).
    table_bytes = vp * dp * 4              # single-buffered resident table
    out_bytes = 2 * ts * dp * 4            # double-buffered output tiles
    idx_bytes = 2 * ts * 128 * 4           # lane-padded ids, double-buffered
    onehot_bytes = ts * vp * 2             # bf16 one-hot working set
    est = table_bytes + out_bytes + idx_bytes + onehot_bytes
    vmem_limit = int(min(max(2 * est, 16 * 2 ** 20), 48 * 2 ** 20))

    out_p = pl.pallas_call(
        _embedding_onehot_kernel,
        out_shape=jax.ShapeDtypeStruct((np_rows, dp), table_p.dtype),
        grid=(np_rows // ts,),
        in_specs=[
            pl.BlockSpec((ts, 1), lambda i: (i, 0)),            # token ids
            pl.BlockSpec((vp, dp), lambda i: (0, 0),            # full table,
                         pipeline_mode=pl.Buffered(1)),          # single-buffered
        ],
        out_specs=pl.BlockSpec((ts, dp), lambda i: (i, 0)),
        compiler_params=pltpu.CompilerParams(
            dimension_semantics=("parallel",),
            vmem_limit_bytes=vmem_limit),
    )(idx, table_p)

    # Strip row/lane padding outside the kernel and restore the input layout.
    return out_p[:n, :d].reshape(*lead, d)


class EmbeddingSeq:
    """Frozen-embedding lookup mirroring the PyTorch EmbeddingSeq module."""

    def __init__(self, table, *, tile_s=512):
        table = jnp.asarray(table, jnp.float32)
        self.num_embeddings, self.embedding_dim = table.shape
        vp = _round_up(self.num_embeddings, 128)   # MXU contraction dim
        dp = _round_up(self.embedding_dim, 128)    # 300 -> 384: dense vst
        # Padding / layout done ONCE here (frozen weights), not per call.
        self.table_p = jnp.pad(
            table, ((0, vp - self.num_embeddings), (0, dp - self.embedding_dim)))
        self.tile_s = tile_s

    def __call__(self, x, *, use_kernel=None):
        return _embedding_seq_fwd(
            x, self.table_p,
            d=self.embedding_dim, tile_s=self.tile_s, use_kernel=use_kernel)


if __name__ == "__main__":
    key = jax.random.PRNGKey(0)
    k_tab, k_idx = jax.random.split(key)

    # Deterministic "pre-trained" embedding table (stands in for the pickle).
    table = jax.random.normal(k_tab, (NUM_EMBEDDINGS, EMBED_DIM),
                              dtype=jnp.float32)
    emb = EmbeddingSeq(table)

    # Small example input: batch=2, seq=8 of integer token ids.
    B, S = 2, 8
    x = jax.random.randint(k_idx, (B, S), 0, NUM_EMBEDDINGS, dtype=jnp.int32)

    # Force the Pallas kernel path so it is exercised even at this tiny size.
    out = emb(x, use_kernel=True)
    out = jax.block_until_ready(out)

    ref = table[x]
    assert out.shape == (B, S, EMBED_DIM)
    assert jnp.allclose(out, ref, atol=1e-6, rtol=1e-6), \
        "mismatch vs reference embedding lookup (kernel path)"

    # Auto-dispatch path (small N -> plain gather) must also match.
    out_auto = jax.block_until_ready(emb(x))
    assert jnp.allclose(out_auto, ref, atol=1e-6, rtol=1e-6), \
        "mismatch vs reference embedding lookup (auto path)"

    print("KERNEL_OK")
</pallas_src>

<mosaic_0001>
module attributes {stable_mosaic.version = 11 : i64} {
  func.func @_embedding_onehot_kernel(%arg0: i32, %arg1: memref<16x1xi32, #tpu.memory_space<vmem>>, %arg2: memref<128x384xf32, #tpu.memory_space<vmem>>, %arg3: memref<16x384xf32, #tpu.memory_space<vmem>>) attributes {dimension_semantics = [#tpu.dimension_semantics<parallel>], iteration_bounds = array<i64: 1>, scalar_prefetch = 0 : i64, scratch_operands = 0 : i64, tpu.core_type = #tpu.core_type<tc>, window_params = [{transform_indices = @transform_0, window_bounds = array<i64: 16, 1>}, {pipeline_mode = #tpu.pipeline_mode<synchronous>, transform_indices = @transform_1, window_bounds = array<i64: 128, 384>}, {transform_indices = @transform_2, window_bounds = array<i64: 16, 384>}]} {
    %c0 = arith.constant 0 : index
    %c0_0 = arith.constant 0 : index
    %0 = vector.load %arg1[%c0, %c0_0] : memref<16x1xi32, #tpu.memory_space<vmem>>, vector<16x1xi32>
    %1 = tpu.iota {dimensions = array<i32: 1>} : vector<16x128xi32>
    %2 = vector.broadcast %0 : vector<16x1xi32> to vector<16x128xi32>
    %3 = arith.cmpi eq, %1, %2 : vector<16x128xi32>
    %4 = arith.extui %3 : vector<16x128xi1> to vector<16x128xi32>
    %5 = arith.sitofp %4 : vector<16x128xi32> to vector<16x128xf32>
    %6 = arith.truncf %5 : vector<16x128xf32> to vector<16x128xbf16>
    %c0_1 = arith.constant 0 : index
    %c0_2 = arith.constant 0 : index
    %7 = vector.load %arg2[%c0_1, %c0_2] : memref<128x384xf32, #tpu.memory_space<vmem>>, vector<128x384xf32>
    %cst = arith.constant dense<0.000000e+00> : vector<16x384xf32>
    %8 = tpu.matmul %6, %7, %cst {dimension_numbers = #tpu.dot_dimension_numbers<[1], [0], [0], [1], [0, 0, 1, 1], [], []>} : vector<16x128xbf16>, vector<128x384xf32>, vector<16x384xf32> -> vector<16x384xf32>
    %c0_3 = arith.constant 0 : index
    %c0_4 = arith.constant 0 : index
    %9 = vector.load %arg3[%c0_3, %c0_4] : memref<16x384xf32, #tpu.memory_space<vmem>>, vector<16x384xf32>
    tpu.vector_store %arg3[%c0_3, %c0_4], %8 {strides = array<i32>} : memref<16x384xf32, #tpu.memory_space<vmem>>, vector<16x384xf32>,
    return
  }
  func.func @transform_0(%arg0: i32) -> (i32, i32) {
    %c0_i32 = arith.constant 0 : i32
    %c0_i32_0 = arith.constant 0 : i32
    return %arg0, %c0_i32 : i32, i32
  }
  func.func @transform_1(%arg0: i32) -> (i32, i32) {
    %c0_i32 = arith.constant 0 : i32
    %c0_i32_0 = arith.constant 0 : i32
    %c0_i32_1 = arith.constant 0 : i32
    return %c0_i32, %c0_i32_0 : i32, i32
  }
  func.func @transform_2(%arg0: i32) -> (i32, i32) {
    %c0_i32 = arith.constant 0 : i32
    %c0_i32_0 = arith.constant 0 : i32
    return %arg0, %c0_i32 : i32, i32
  }
}

</mosaic_0001>

<bundles_post_ra>
// kernel: _embedding_seq_fwd.1
= control target key start
LH: loop header
LB: loop body
LE: loop exit
PB: predicated region body
PF: predicated region fallthrough
CT: control target
= control target key end

     0   :  { %7 = vsyncpa [#allocation3], 0  ;;  %s398_s9 = smov [#allocation2]   ;;  %s465_s0 = inlined_call_operand.vmem [shape: s32[16,1], index: 0, kind: input, shape index: {}]   ;;  %s466_s1 = inlined_call_operand.hbm [shape: f32[128,384], index: 1, kind: input, shape index: {}]   ;;  %s467_s2 = inlined_call_operand.vmem [shape: f32[16,384], index: 2, kind: output, shape index: {}]  }
   0x1   :  { %s15_s10 = sshll.u32 %s398_s9, 4  ;;  %s374_s13 = scalar_lea.hbm %s466_s1, 6144  ;;  %s16_s10 = int_to_ptr.vmem [resolvable:$true] %s15_s10 }
   0x2   :  { %p375_p0 = scmp.ne.s32.totalorder %s466_s1, %s374_s13  ;;  %p378_p1 = scmp.lt.u32.totalorder %s374_s13, %s466_s1 }
   0x4   :  { %p380_p2 = pnand %p378_p1, %p375_p0 }
   0x6   :  { %383 = shalt.err (!%p380_p2)
}
   0x7   :  { %s384_s18 = scalar_lea.vmem %s16_s10, 6144  ;;  %p389_p4 = scmp.lt.s32.totalorder %s16_s10, %s16_s10 }
   0x8   :  { %p385_p3 = scmp.ne.s32.totalorder %s16_s10, %s384_s18  ;;  %p390_p5 = scmp.lt.s32.totalorder %s384_s18, %s384_s18 }
   0xa   :  { %p391_p6 = por %p390_p5, %p389_p4 }
   0xc   :  { %p392_p7 = pnand %p391_p6, %p385_p3 }
   0xe   :  { %395 = shalt.err (!%p392_p7)
}
   0xf   :  { %s399_s19 = smov 384   ;;  %s400_s20 = smov 24  }
  0x10   :  { %21 = dma.hbm_to_vmem [thread:$0]  %s466_s1, 6144, %s16_s10, [#allocation3], %s399_s19, %s399_s19, %s400_s20  }
  0x11   :  { %396 = dma.done.wait [#allocation3], 6144  }
  0x12   :  { %397 = vsyncadd [#allocation3], 4294961152  ;;  %v401_v0 = vmov 0   ;;  %v402_v1 = vmov 0.0|0.0   ;;  %v26_v2 = vld [vmem:[%s465_s0] sm:$0xff]  ;;  %v27_v3 = vld [vmem:[%s465_s0 + $0x8] sm:$0xff] }
  0x13   :  { %373 = vset.pattern.permute.xlu0 %v401_v0  ;;  %341 = vmatprep.subr.bf16.mxu1 %v402_v1  ;;  %v44_v4 = vld [vmem:[#allocation2 + $0x8] sm:$0xff]  ;;  %v47_v5 = vld [vmem:[#allocation2 + $0x20] sm:$0xff]  ;;  %v46_v7 = vld [vmem:[#allocation2 + $0x18] sm:$0xff]  ;;  %vm403_vm0 = vmmov 0   ;;  %v404_v31 = vmov 0.0  }
  0x14   :  { %155 = vmatprep.mubr.bf16.mxu0 %v401_v0  ;;  %31 = vperm.xlu0 %373, %v26_v2   ;;  %v43_v6 = vld [vmem:[#allocation2] sm:$0xff]  ;;  %v309_v8 = vpack.c.bf16 %v47_v5, %v44_v4  ;;  %v45_v10 = vld [vmem:[#allocation2 + $0x10] sm:$0xff]  ;;  %v48_v11 = vld [vmem:[#allocation2 + $0x28] sm:$0xff] }
  0x15   :  { %v311_v9 = vpack.c.bf16 %v46_v7, %v43_v6  ;;  %v50_v12 = vld [vmem:[#allocation2 + $0x38] sm:$0xff]  ;;  %v342_v13 = vpack.c.bf16 %v48_v11, %v45_v10  ;;  %v53_v14 = vld [vmem:[#allocation2 + $0x50] sm:$0xff]  ;;  %v52_v16 = vld [vmem:[#allocation2 + $0x48] sm:$0xff]  ;;  %305 = vmatprep.mubr.msk.bf16.mxu1 %vm403_vm0, %v404_v31 }
  0x16   :  { %v49_v15 = vld [vmem:[#allocation2 + $0x30] sm:$0xff]  ;;  %310 = vmatprep.subr.bf16.mxu0 %v309_v8  ;;  %v313_v17 = vpack.c.bf16 %v53_v14, %v50_v12  ;;  %v51_v18 = vld [vmem:[#allocation2 + $0x40] sm:$0xff]  ;;  %v54_v19 = vld [vmem:[#allocation2 + $0x58] sm:$0xff]  ;;  %v28_v14 = vlaneseq }
  0x17   :  { %v56_v20 = vld [vmem:[#allocation2 + $0x68] sm:$0xff]  ;;  %312 = vmatpush1.bf16.msra.mxu0 %v311_v9  ;;  %v315_v21 = vpack.c.bf16 %v52_v16, %v49_v15  ;;  %v59_v22 = vld [vmem:[#allocation2 + $0x80] sm:$0xff]  ;;  %343 = vmatpush3.bf16.msra.mxu1 %v342_v13  ;;  %v345_v23 = vpack.c.bf16 %v54_v19, %v51_v18  ;;  %v58_v26 = vld [vmem:[#allocation2 + $0x78] sm:$0xff]  ;;  %v405_v18 = vmov 1.0|1.0  }
  0x18   :  { %34 = vperm.xlu0 %373, %v27_v3   ;;  %314 = vmatprep.subr.bf16.mxu0 %v313_v17  ;;  %v317_v24 = vpack.c.bf16 %v59_v22, %v56_v20  ;;  %v55_v25 = vld [vmem:[#allocation2 + $0x60] sm:$0xff]  ;;  %v57_v27 = vld [vmem:[#allocation2 + $0x70] sm:$0xff]  ;;  %v60_v28 = vld [vmem:[#allocation2 + $0x88] sm:$0xff]  ;;  %v29_v16 = vand.u32 127, %v28_v14 }
  0x19   :  { %344 = vmatprep.subr.bf16.mxu1 %v402_v1  ;;  %v62_v29 = vld [vmem:[#allocation2 + $0x98] sm:$0xff]  ;;  %v65_v30 = vld [vmem:[#allocation2 + $0xb0] sm:$0xff]  ;;  %v319_v32 = vpack.c.bf16 %v58_v26, %v55_v25  ;;  %v348_v33 = vpack.c.bf16 %v60_v28, %v57_v27  ;;  %v64_v36 = vld [vmem:[#allocation2 + $0xa8] sm:$0xff] }
  0x1a   :  { %v321_v34 = vpack.c.bf16 %v65_v30, %v62_v29  ;;  %v61_v35 = vld [vmem:[#allocation2 + $0x90] sm:$0xff]  ;;  %v63_v37 = vld [vmem:[#allocation2 + $0xa0] sm:$0xff]  ;;  %v66_v38 = vld [vmem:[#allocation2 + $0xb8] sm:$0xff] }
  0x1b   :  { %316 = vmatpush1.bf16.msra.mxu0 %v315_v21  ;;  %346 = vmatpush3.bf16.msra.mxu1 %v345_v23  ;;  %v68_v39 = vld [vmem:[#allocation2 + $0xc8] sm:$0xff]  ;;  %v71_v40 = vld [vmem:[#allocation2 + $0xe0] sm:$0xff]  ;;  %v323_v41 = vpack.c.bf16 %v64_v36, %v61_v35  ;;  %v351_v42 = vpack.c.bf16 %v66_v38, %v63_v37  ;;  %v70_v45 = vld [vmem:[#allocation2 + $0xd8] sm:$0xff] }
  0x1c   :  { %318 = vmatprep.subr.bf16.mxu0 %v317_v24  ;;  %347 = vmatprep.subr.bf16.mxu1 %v402_v1  ;;  %v325_v43 = vpack.c.bf16 %v71_v40, %v68_v39  ;;  %v67_v44 = vld [vmem:[#allocation2 + $0xc0] sm:$0xff]  ;;  %v69_v46 = vld [vmem:[#allocation2 + $0xd0] sm:$0xff]  ;;  %v72_v47 = vld [vmem:[#allocation2 + $0xe8] sm:$0xff] }
  0x1d   :  { %v74_v48 = vld [vmem:[#allocation2 + $0xf8] sm:$0xff]  ;;  %v77_v49 = vld [vmem:[#allocation2 + $0x110] sm:$0xff]  ;;  %v327_v50 = vpack.c.bf16 %v70_v45, %v67_v44  ;;  %v354_v51 = vpack.c.bf16 %v72_v47, %v69_v46  ;;  %v76_v54 = vld [vmem:[#allocation2 + $0x108] sm:$0xff] }
  0x1e   :  { %v329_v52 = vpack.c.bf16 %v77_v49, %v74_v48  ;;  %v73_v53 = vld [vmem:[#allocation2 + $0xf0] sm:$0xff]  ;;  %v75_v55 = vld [vmem:[#allocation2 + $0x100] sm:$0xff]  ;;  %v78_v56 = vld [vmem:[#allocation2 + $0x118] sm:$0xff] }
  0x1f   :  { %320 = vmatpush1.bf16.msra.mxu0 %v319_v32  ;;  %349 = vmatpush3.bf16.msra.mxu1 %v348_v33  ;;  %v80_v57 = vld [vmem:[#allocation2 + $0x128] sm:$0xff]  ;;  %v83_v58 = vld [vmem:[#allocation2 + $0x140] sm:$0xff]  ;;  %v331_v59 = vpack.c.bf16 %v76_v54, %v73_v53  ;;  %v357_v60 = vpack.c.bf16 %v78_v56, %v75_v55  ;;  %v82_v63 = vld [vmem:[#allocation2 + $0x138] sm:$0xff] }
  0x20   :  { %322 = vmatprep.subr.bf16.mxu0 %v321_v34  ;;  %350 = vmatprep.subr.bf16.mxu1 %v402_v1  ;;  %v333_v61 = vpack.c.bf16 %v83_v58, %v80_v57  ;;  %v79_v62 = vld [vmem:[#allocation2 + $0x120] sm:$0xff]  ;;  %v81_v0 = vld [vmem:[#allocation2 + $0x130] sm:$0xff]  ;;  %v84_v2 = vld [vmem:[#allocation2 + $0x148] sm:$0xff] }
  0x21   :  { %v86_v3 = vld [vmem:[#allocation2 + $0x158] sm:$0xff]  ;;  %v89_v4 = vld [vmem:[#allocation2 + $0x170] sm:$0xff]  ;;  %v335_v5 = vpack.c.bf16 %v82_v63, %v79_v62  ;;  %v360_v6 = vpack.c.bf16 %v84_v2, %v81_v0  ;;  %v88_v9 = vld [vmem:[#allocation2 + $0x168] sm:$0xff] }
  0x22   :  { %v337_v7 = vpack.c.bf16 %v89_v4, %v86_v3  ;;  %v85_v8 = vld [vmem:[#allocation2 + $0x150] sm:$0xff]  ;;  %v87_v10 = vld [vmem:[#allocation2 + $0x160] sm:$0xff]  ;;  %v90_v11 = vld [vmem:[#allocation2 + $0x178] sm:$0xff] }
  0x23   :  { %324 = vmatpush1.bf16.msra.mxu0 %v323_v41  ;;  %352 = vmatpush3.bf16.msra.mxu1 %v351_v42  ;;  %v339_v12 = vpack.c.bf16 %v88_v9, %v85_v8  ;;  %v363_v13 = vpack.c.bf16 %v90_v11, %v87_v10 }
  0x24   :  { %326 = vmatprep.subr.bf16.mxu0 %v325_v43  ;;  %353 = vmatprep.subr.bf16.mxu1 %v402_v1 }
  0x27   :  { %328 = vmatpush1.bf16.msra.mxu0 %v327_v50  ;;  %355 = vmatpush3.bf16.msra.mxu1 %v354_v51 }
  0x28   :  { %330 = vmatprep.subr.bf16.mxu0 %v329_v52  ;;  %356 = vmatprep.subr.bf16.mxu1 %v402_v1 }
  0x2b   :  { %332 = vmatpush1.bf16.msra.mxu0 %v331_v59  ;;  %358 = vmatpush3.bf16.msra.mxu1 %v357_v60 }
  0x2c   :  { %334 = vmatprep.subr.bf16.mxu0 %v333_v61  ;;  %359 = vmatprep.subr.bf16.mxu1 %v402_v1 }
  0x2f   :  { %336 = vmatpush1.bf16.msra.mxu0 %v335_v5  ;;  %361 = vmatpush3.bf16.msra.mxu1 %v360_v6 }
  0x30   :  { %338 = vmatprep.subr.bf16.mxu0 %v337_v7  ;;  %362 = vmatprep.subr.bf16.mxu1 %v402_v1 }
  0x33   :  { %340 = vmatpush1.bf16.msra.mxu0 %v339_v12  ;;  %364 = vmatpush3.bf16.msra.mxu1 %v363_v13 }
  0x93   :  { %v32_v15 = vpop.permute.xlu0 %31 }
  0x94   :  { %vm36_vm1 = vcmp.eq.s32.totalorder %v29_v16, %v32_v15 }
  0x97   :  { %v35_v17 = vpop.permute.xlu0 %34 }
  0x98   :  { %vm37_vm2 = vcmp.eq.s32.totalorder %v29_v16, %v35_v17 }
  0x99   :  { %vm252_vm3 = vmpackc.low %vm37_vm2, %vm36_vm1 }
  0x9a   :  { %253 = vmatmul.mubr.msk.bf16.vlgmr.msra.gmra.mrb[0].mxu0 %vm252_vm3, %v405_v18  ;;  %306 = vmatmul.mubr.msk.bf16.vlgmr.msra.gmra.mrb[0].mxu1 %vm252_vm3, %v405_v18 }
 0x16d   :  { %v157_v19 = vpop.f32.mrb[0].mxu0  ;;  %v232_v20 = vpop.f32.mrb[0].mxu1 }
 0x16e   :  { %239 = vst [vmem:[%s467_s2] sm:$0xff] %v157_v19  ;;  %241 = vst [vmem:[%s467_s2 + $0x10] sm:$0xff] %v232_v20  ;;  %v159_v1 = vpop.f32.mrb[1].mxu0  ;;  %v307_v21 = vpop.f32.mrb[1].mxu1 }
 0x16f   :  { %240 = vst [vmem:[%s467_s2 + $0x8] sm:$0xff] %v159_v1  ;;  %v161_v22 = vpop.f32.mrb[2].mxu0  ;;  %v235_v23 = vpop.f32.mrb[2].mxu1 }
 0x170   :  { %242 = vst [vmem:[%s467_s2 + $0x18] sm:$0xff] %v161_v22  ;;  %244 = vst [vmem:[%s467_s2 + $0x28] sm:$0xff] %v235_v23  ;;  %v163_v24 = vpop.f32.mrb[3].mxu0  ;;  %v308_v25 = vpop.f32.mrb[3].mxu1 }
 0x171   :  { %243 = vst [vmem:[%s467_s2 + $0x20] sm:$0xff] %v163_v24 }
 0x172   :  { %249 = vsyncpa [#allocation3], 1 }

</bundles_post_ra>
